<compile_context>
chip_gen: v7x
topology: tpu7x:2x2x1
jax: 0.10.0
libtpu: 0.0.40
codegen_flags: <defaults>
</compile_context>

<pallas_src>
import jax
import jax.numpy as jnp
import numpy as np
from jax.experimental import pallas as pl
from jax.experimental.pallas import tpu as pltpu

_VMEM = pl.BlockSpec(memory_space=pltpu.MemorySpace.VMEM)


# ---------------------------------------------------------------------------
# Fused kernel: conv3x3+ReLU -> global-avg-pool+Linear -> projector -> predictor
# ---------------------------------------------------------------------------
def online_fused_kernel(xp_ref,                    # (N, H+2, W*Cin)   H-padded, lane-collapsed NHWC
                        convB_ref,                 # (3, W*Cin, W*Cout) row-Toeplitz conv weights
                        convb_ref,                 # (1, W*Cout)        tiled conv bias
                        encw_ref,                  # (W*Cout, D)        pool-folded encoder weights
                        encb_ref,                  # (1, D)
                        pw1_ref, pb1_ref, pg_ref, pbe_ref, pw2_ref, pb2_ref,   # projector
                        qw1_ref, qb1_ref, qg_ref, qbe_ref, qw2_ref, qb2_ref,   # predictor
                        o_ref):                    # (N, Dz)
    N, HP, WC = xp_ref.shape
    H = HP - 2
    WCOUT = convB_ref.shape[-1]                    # lane-dense conv width (= 128 here)

    # ---- encoder conv stage: 3 lane-dense row-Toeplitz matmuls, K = W*Cin ----
    acc = jnp.zeros((N * H, WCOUT), jnp.float32)
    for kh in range(3):                            # static unroll, 3 MXU pushes total
        slab = xp_ref[:, kh:kh + H, :].reshape(N * H, WC)       # (N*H, W*Cin)
        acc = acc + jnp.dot(slab, convB_ref[kh],
                            preferred_element_type=jnp.float32)
    fmap = jnp.maximum(acc + convb_ref[...], 0.0)               # (N*H, W*Cout), full-lane

    # ---- global average pool + encoder Linear (pool folded into encw) ----
    s = jnp.sum(fmap.reshape(N, H, WCOUT), axis=1)              # (N, W*Cout)
    y = jnp.dot(s, encw_ref[...],
                preferred_element_type=jnp.float32) + encb_ref[...]   # (N, D)

    # ---- Linear -> BatchNorm1d (training batch stats, eps=1e-5) -> ReLU -> Linear ----
    def mlp_head(x, w1, b1, g, beta, w2, b2):
        h = jnp.dot(x, w1, preferred_element_type=jnp.float32) + b1
        mean = jnp.mean(h, axis=0, keepdims=True)
        var = jnp.mean((h - mean) ** 2, axis=0, keepdims=True)  # biased variance (BN fwd)
        hn = (h - mean) * jax.lax.rsqrt(var + 1e-5) * g + beta
        hn = jnp.maximum(hn, 0.0)
        return jnp.dot(hn, w2, preferred_element_type=jnp.float32) + b2

    z = mlp_head(y, pw1_ref[...], pb1_ref[...], pg_ref[...], pbe_ref[...],
                 pw2_ref[...], pb2_ref[...])                    # projector
    q = mlp_head(z, qw1_ref[...], qb1_ref[...], qg_ref[...], qbe_ref[...],
                 qw2_ref[...], qb2_ref[...])                    # predictor
    o_ref[...] = q


# ---------------------------------------------------------------------------
# Wrapper: layout / weight preparation (tiny, parameter-side XLA ops) + pallas_call
# ---------------------------------------------------------------------------
def online_network_forward(x_nchw, p):
    N, Cin, H, W = x_nchw.shape
    KH, KW, _, Cout = p["conv_w"].shape
    D = p["enc_w"].shape[-1]
    Dz = p["pred_w2"].shape[-1]

    # Input layout: NCHW -> (N, H, W*Cin); pad only H (W padding is folded into
    # the Toeplitz weights below).
    x_rows = jnp.transpose(x_nchw, (0, 2, 3, 1)).reshape(N, H, W * Cin)
    xp = jnp.pad(x_rows, ((0, 0), (1, 1), (0, 0)))              # (N, H+2, W*Cin)

    # Row-Toeplitz conv weights: B[kh, w'*Cin+cin, w*Cout+cout] =
    #   conv_w[kh, w'-w+1, cin, cout] if 0 <= w'-w+1 < 3 else 0.
    M = np.zeros((KW, W, W), np.float32)
    for kw in range(KW):
        for w in range(W):
            wp = w + kw - 1
            if 0 <= wp < W:
                M[kw, wp, w] = 1.0
    convB = jnp.einsum("apw,kaco->kpcwo", jnp.asarray(M),
                       p["conv_w"]).reshape(KH, W * Cin, W * Cout)
    convb = jnp.tile(p["conv_b"], (1, W))                       # (1, W*Cout)
    encw = jnp.tile(p["enc_w"], (W, 1)) / float(H * W)          # (W*Cout, D), pool folded in

    return pl.pallas_call(
        online_fused_kernel,
        out_shape=jax.ShapeDtypeStruct((N, Dz), jnp.float32),
        in_specs=[_VMEM] * 17,
        out_specs=_VMEM,
    )(xp, convB, convb, encw, p["enc_b"],
      p["proj_w1"], p["proj_b1"], p["proj_g"], p["proj_beta"], p["proj_w2"], p["proj_b2"],
      p["pred_w1"], p["pred_b1"], p["pred_g"], p["pred_beta"], p["pred_w2"], p["pred_b2"])


# ---------------------------------------------------------------------------
# Deterministic parameter init + pure-JAX reference
# ---------------------------------------------------------------------------
def init_params(key):
    Cin, Cout, D, Hh, Dz = 4, 8, 32, 64, 16
    ks = jax.random.split(key, 16)
    n = lambda k, shape, s=0.1: (s * jax.random.normal(k, shape)).astype(jnp.float32)
    return {
        "conv_w": n(ks[0], (3, 3, Cin, Cout)),  "conv_b": n(ks[1], (1, Cout), 0.01),
        "enc_w":  n(ks[2], (Cout, D)),          "enc_b":  n(ks[3], (1, D), 0.01),
        "proj_w1": n(ks[4], (D, Hh)),           "proj_b1": n(ks[5], (1, Hh), 0.01),
        "proj_g":  jnp.ones((1, Hh), jnp.float32) + n(ks[6], (1, Hh), 0.01),
        "proj_beta": n(ks[7], (1, Hh), 0.01),
        "proj_w2": n(ks[8], (Hh, Dz)),          "proj_b2": n(ks[9], (1, Dz), 0.01),
        "pred_w1": n(ks[10], (Dz, Hh)),         "pred_b1": n(ks[11], (1, Hh), 0.01),
        "pred_g":  jnp.ones((1, Hh), jnp.float32) + n(ks[12], (1, Hh), 0.01),
        "pred_beta": n(ks[13], (1, Hh), 0.01),
        "pred_w2": n(ks[14], (Hh, Dz)),         "pred_b2": n(ks[15], (1, Dz), 0.01),
    }


def _ref_mlp_head(x, w1, b1, g, beta, w2, b2):
    h = x @ w1 + b1[0]
    mean = h.mean(axis=0, keepdims=True)
    var = ((h - mean) ** 2).mean(axis=0, keepdims=True)
    hn = (h - mean) / jnp.sqrt(var + 1e-5) * g[0] + beta[0]
    return jnp.maximum(hn, 0.0) @ w2 + b2[0]


def reference_forward(x_nchw, p):
    x = jnp.transpose(x_nchw, (0, 2, 3, 1))
    N, H, W, Cin = x.shape
    xp = jnp.pad(x, ((0, 0), (1, 1), (1, 1), (0, 0)))
    acc = jnp.zeros((N, H, W, p["conv_w"].shape[-1]), jnp.float32)
    for kh in range(3):
        for kw in range(3):
            acc = acc + jnp.einsum("nhwc,co->nhwo",
                                   xp[:, kh:kh + H, kw:kw + W, :], p["conv_w"][kh, kw])
    fmap = jnp.maximum(acc + p["conv_b"][0], 0.0)
    y = fmap.mean(axis=(1, 2)) @ p["enc_w"] + p["enc_b"][0]
    z = _ref_mlp_head(y, p["proj_w1"], p["proj_b1"], p["proj_g"], p["proj_beta"],
                      p["proj_w2"], p["proj_b2"])
    return _ref_mlp_head(z, p["pred_w1"], p["pred_b1"], p["pred_g"], p["pred_beta"],
                         p["pred_w2"], p["pred_b2"])


if __name__ == "__main__":
    key = jax.random.PRNGKey(0)
    kx, kp = jax.random.split(key)
    x = jax.random.normal(kx, (2, 4, 16, 16), jnp.float32)   # NCHW, like PyTorch
    params = init_params(kp)

    fwd = jax.jit(online_network_forward)
    q = fwd(x, params)
    q = jax.block_until_ready(q)

    q_ref = reference_forward(x, params)
    if not np.allclose(np.asarray(q), np.asarray(q_ref), atol=2e-4, rtol=2e-4):
        raise AssertionError("Pallas output does not match reference")
    print("KERNEL_OK")
</pallas_src>

<mosaic_0001>
module attributes {stable_mosaic.version = 11 : i64} {
  func.func @online_fused_kernel(%arg0: memref<2x18x64xf32, #tpu.memory_space<vmem>>, %arg1: memref<3x64x128xf32, #tpu.memory_space<vmem>>, %arg2: memref<1x128xf32, #tpu.memory_space<vmem>>, %arg3: memref<128x32xf32, #tpu.memory_space<vmem>>, %arg4: memref<1x32xf32, #tpu.memory_space<vmem>>, %arg5: memref<32x64xf32, #tpu.memory_space<vmem>>, %arg6: memref<1x64xf32, #tpu.memory_space<vmem>>, %arg7: memref<1x64xf32, #tpu.memory_space<vmem>>, %arg8: memref<1x64xf32, #tpu.memory_space<vmem>>, %arg9: memref<64x16xf32, #tpu.memory_space<vmem>>, %arg10: memref<1x16xf32, #tpu.memory_space<vmem>>, %arg11: memref<16x64xf32, #tpu.memory_space<vmem>>, %arg12: memref<1x64xf32, #tpu.memory_space<vmem>>, %arg13: memref<1x64xf32, #tpu.memory_space<vmem>>, %arg14: memref<1x64xf32, #tpu.memory_space<vmem>>, %arg15: memref<64x16xf32, #tpu.memory_space<vmem>>, %arg16: memref<1x16xf32, #tpu.memory_space<vmem>>, %arg17: memref<2x16xf32, #tpu.memory_space<vmem>>) attributes {dimension_semantics = [], scalar_prefetch = 0 : i64, scratch_operands = 0 : i64, tpu.core_type = #tpu.core_type<tc>} {
    %cst = arith.constant 0.000000e+00 : f32
    %0 = vector.broadcast %cst : f32 to vector<32x128xf32>
    %c0 = arith.constant 0 : index
    %c0_0 = arith.constant 0 : index
    %c0_1 = arith.constant 0 : index
    %1 = vector.load %arg0[%c0, %c0_0, %c0_1] : memref<2x18x64xf32, #tpu.memory_space<vmem>>, vector<2x16x64xf32>
    %2 = vector.shape_cast %1 : vector<2x16x64xf32> to vector<32x64xf32>
    %c0_2 = arith.constant 0 : index
    %c0_3 = arith.constant 0 : index
    %c0_4 = arith.constant 0 : index
    %3 = vector.load %arg1[%c0_2, %c0_3, %c0_4] : memref<3x64x128xf32, #tpu.memory_space<vmem>>, vector<1x64x128xf32>
    %4 = vector.shape_cast %3 : vector<1x64x128xf32> to vector<64x128xf32>
    %cst_5 = arith.constant dense<0.000000e+00> : vector<32x128xf32>
    %5 = tpu.matmul %2, %4, %cst_5 {dimension_numbers = #tpu.dot_dimension_numbers<[1], [0], [0], [1], [0, 0, 1, 1], [], []>} : vector<32x64xf32>, vector<64x128xf32>, vector<32x128xf32> -> vector<32x128xf32>
    %6 = arith.addf %0, %5 : vector<32x128xf32>
    %c0_6 = arith.constant 0 : index
    %c1 = arith.constant 1 : index
    %c0_7 = arith.constant 0 : index
    %7 = vector.load %arg0[%c0_6, %c1, %c0_7] : memref<2x18x64xf32, #tpu.memory_space<vmem>>, vector<2x16x64xf32>
    %8 = vector.shape_cast %7 : vector<2x16x64xf32> to vector<32x64xf32>
    %c1_8 = arith.constant 1 : index
    %c0_9 = arith.constant 0 : index
    %c0_10 = arith.constant 0 : index
    %9 = vector.load %arg1[%c1_8, %c0_9, %c0_10] : memref<3x64x128xf32, #tpu.memory_space<vmem>>, vector<1x64x128xf32>
    %10 = vector.shape_cast %9 : vector<1x64x128xf32> to vector<64x128xf32>
    %cst_11 = arith.constant dense<0.000000e+00> : vector<32x128xf32>
    %11 = tpu.matmul %8, %10, %cst_11 {dimension_numbers = #tpu.dot_dimension_numbers<[1], [0], [0], [1], [0, 0, 1, 1], [], []>} : vector<32x64xf32>, vector<64x128xf32>, vector<32x128xf32> -> vector<32x128xf32>
    %12 = arith.addf %6, %11 : vector<32x128xf32>
    %c0_12 = arith.constant 0 : index
    %c2 = arith.constant 2 : index
    %c0_13 = arith.constant 0 : index
    %13 = vector.load %arg0[%c0_12, %c2, %c0_13] : memref<2x18x64xf32, #tpu.memory_space<vmem>>, vector<2x16x64xf32>
    %14 = vector.shape_cast %13 : vector<2x16x64xf32> to vector<32x64xf32>
    %c2_14 = arith.constant 2 : index
    %c0_15 = arith.constant 0 : index
    %c0_16 = arith.constant 0 : index
    %15 = vector.load %arg1[%c2_14, %c0_15, %c0_16] : memref<3x64x128xf32, #tpu.memory_space<vmem>>, vector<1x64x128xf32>
    %16 = vector.shape_cast %15 : vector<1x64x128xf32> to vector<64x128xf32>
    %cst_17 = arith.constant dense<0.000000e+00> : vector<32x128xf32>
    %17 = tpu.matmul %14, %16, %cst_17 {dimension_numbers = #tpu.dot_dimension_numbers<[1], [0], [0], [1], [0, 0, 1, 1], [], []>} : vector<32x64xf32>, vector<64x128xf32>, vector<32x128xf32> -> vector<32x128xf32>
    %18 = arith.addf %12, %17 : vector<32x128xf32>
    %c0_18 = arith.constant 0 : index
    %c0_19 = arith.constant 0 : index
    %19 = vector.load %arg2[%c0_18, %c0_19] : memref<1x128xf32, #tpu.memory_space<vmem>>, vector<1x128xf32>
    %20 = vector.broadcast %19 : vector<1x128xf32> to vector<32x128xf32>
    %21 = arith.addf %18, %20 : vector<32x128xf32>
    %cst_20 = arith.constant 0.000000e+00 : f32
    %22 = vector.broadcast %cst_20 : f32 to vector<32x128xf32>
    %23 = arith.maximumf %21, %22 : vector<32x128xf32>
    %24 = vector.shape_cast %23 : vector<32x128xf32> to vector<2x16x128xf32>
    %cst_21 = arith.constant dense<0.000000e+00> : vector<2x128xf32>
    %25 = vector.multi_reduction <add>, %24, %cst_21 [1] : vector<2x16x128xf32> to vector<2x128xf32>
    %c0_22 = arith.constant 0 : index
    %c0_23 = arith.constant 0 : index
    %26 = vector.load %arg3[%c0_22, %c0_23] : memref<128x32xf32, #tpu.memory_space<vmem>>, vector<128x32xf32>
    %cst_24 = arith.constant dense<0.000000e+00> : vector<2x32xf32>
    %27 = tpu.matmul %25, %26, %cst_24 {dimension_numbers = #tpu.dot_dimension_numbers<[1], [0], [0], [1], [0, 0, 1, 1], [], []>} : vector<2x128xf32>, vector<128x32xf32>, vector<2x32xf32> -> vector<2x32xf32>
    %c0_25 = arith.constant 0 : index
    %c0_26 = arith.constant 0 : index
    %28 = vector.load %arg4[%c0_25, %c0_26] : memref<1x32xf32, #tpu.memory_space<vmem>>, vector<1x32xf32>
    %29 = vector.broadcast %28 : vector<1x32xf32> to vector<2x32xf32>
    %30 = arith.addf %27, %29 : vector<2x32xf32>
    %c0_27 = arith.constant 0 : index
    %c0_28 = arith.constant 0 : index
    %31 = vector.load %arg5[%c0_27, %c0_28] : memref<32x64xf32, #tpu.memory_space<vmem>>, vector<32x64xf32>
    %c0_29 = arith.constant 0 : index
    %c0_30 = arith.constant 0 : index
    %32 = vector.load %arg6[%c0_29, %c0_30] : memref<1x64xf32, #tpu.memory_space<vmem>>, vector<1x64xf32>
    %c0_31 = arith.constant 0 : index
    %c0_32 = arith.constant 0 : index
    %33 = vector.load %arg7[%c0_31, %c0_32] : memref<1x64xf32, #tpu.memory_space<vmem>>, vector<1x64xf32>
    %c0_33 = arith.constant 0 : index
    %c0_34 = arith.constant 0 : index
    %34 = vector.load %arg8[%c0_33, %c0_34] : memref<1x64xf32, #tpu.memory_space<vmem>>, vector<1x64xf32>
    %c0_35 = arith.constant 0 : index
    %c0_36 = arith.constant 0 : index
    %35 = vector.load %arg9[%c0_35, %c0_36] : memref<64x16xf32, #tpu.memory_space<vmem>>, vector<64x16xf32>
    %c0_37 = arith.constant 0 : index
    %c0_38 = arith.constant 0 : index
    %36 = vector.load %arg10[%c0_37, %c0_38] : memref<1x16xf32, #tpu.memory_space<vmem>>, vector<1x16xf32>
    %cst_39 = arith.constant dense<0.000000e+00> : vector<2x64xf32>
    %37 = tpu.matmul %30, %31, %cst_39 {dimension_numbers = #tpu.dot_dimension_numbers<[1], [0], [0], [1], [0, 0, 1, 1], [], []>} : vector<2x32xf32>, vector<32x64xf32>, vector<2x64xf32> -> vector<2x64xf32>
    %38 = vector.broadcast %32 : vector<1x64xf32> to vector<2x64xf32>
    %39 = arith.addf %37, %38 : vector<2x64xf32>
    %cst_40 = arith.constant dense<0.000000e+00> : vector<64xf32>
    %40 = vector.multi_reduction <add>, %39, %cst_40 [0] : vector<2x64xf32> to vector<64xf32>
    %41 = vector.shape_cast %40 : vector<64xf32> to vector<1x64xf32>
    %cst_41 = arith.constant 2.000000e+00 : f32
    %42 = vector.broadcast %cst_41 : f32 to vector<1x64xf32>
    %43 = arith.divf %41, %42 : vector<1x64xf32>
    %44 = vector.broadcast %43 : vector<1x64xf32> to vector<2x64xf32>
    %45 = arith.subf %39, %44 : vector<2x64xf32>
    %46 = arith.mulf %45, %45 : vector<2x64xf32>
    %cst_42 = arith.constant dense<0.000000e+00> : vector<64xf32>
    %47 = vector.multi_reduction <add>, %46, %cst_42 [0] : vector<2x64xf32> to vector<64xf32>
    %48 = vector.shape_cast %47 : vector<64xf32> to vector<1x64xf32>
    %cst_43 = arith.constant 2.000000e+00 : f32
    %49 = vector.broadcast %cst_43 : f32 to vector<1x64xf32>
    %50 = arith.divf %48, %49 : vector<1x64xf32>
    %51 = vector.broadcast %43 : vector<1x64xf32> to vector<2x64xf32>
    %52 = arith.subf %39, %51 : vector<2x64xf32>
    %cst_44 = arith.constant 9.99999974E-6 : f32
    %53 = vector.broadcast %cst_44 : f32 to vector<1x64xf32>
    %54 = arith.addf %50, %53 : vector<1x64xf32>
    %55 = math.rsqrt %54 : vector<1x64xf32>
    %56 = vector.broadcast %55 : vector<1x64xf32> to vector<2x64xf32>
    %57 = arith.mulf %52, %56 : vector<2x64xf32>
    %58 = vector.broadcast %33 : vector<1x64xf32> to vector<2x64xf32>
    %59 = arith.mulf %57, %58 : vector<2x64xf32>
    %60 = vector.broadcast %34 : vector<1x64xf32> to vector<2x64xf32>
    %61 = arith.addf %59, %60 : vector<2x64xf32>
    %cst_45 = arith.constant 0.000000e+00 : f32
    %62 = vector.broadcast %cst_45 : f32 to vector<2x64xf32>
    %63 = arith.maximumf %61, %62 : vector<2x64xf32>
    %cst_46 = arith.constant dense<0.000000e+00> : vector<2x16xf32>
    %64 = tpu.matmul %63, %35, %cst_46 {dimension_numbers = #tpu.dot_dimension_numbers<[1], [0], [0], [1], [0, 0, 1, 1], [], []>} : vector<2x64xf32>, vector<64x16xf32>, vector<2x16xf32> -> vector<2x16xf32>
    %65 = vector.broadcast %36 : vector<1x16xf32> to vector<2x16xf32>
    %66 = arith.addf %64, %65 : vector<2x16xf32>
    %c0_47 = arith.constant 0 : index
    %c0_48 = arith.constant 0 : index
    %67 = vector.load %arg11[%c0_47, %c0_48] : memref<16x64xf32, #tpu.memory_space<vmem>>, vector<16x64xf32>
    %c0_49 = arith.constant 0 : index
    %c0_50 = arith.constant 0 : index
    %68 = vector.load %arg12[%c0_49, %c0_50] : memref<1x64xf32, #tpu.memory_space<vmem>>, vector<1x64xf32>
    %c0_51 = arith.constant 0 : index
    %c0_52 = arith.constant 0 : index
    %69 = vector.load %arg13[%c0_51, %c0_52] : memref<1x64xf32, #tpu.memory_space<vmem>>, vector<1x64xf32>
    %c0_53 = arith.constant 0 : index
    %c0_54 = arith.constant 0 : index
    %70 = vector.load %arg14[%c0_53, %c0_54] : memref<1x64xf32, #tpu.memory_space<vmem>>, vector<1x64xf32>
    %c0_55 = arith.constant 0 : index
    %c0_56 = arith.constant 0 : index
    %71 = vector.load %arg15[%c0_55, %c0_56] : memref<64x16xf32, #tpu.memory_space<vmem>>, vector<64x16xf32>
    %c0_57 = arith.constant 0 : index
    %c0_58 = arith.constant 0 : index
    %72 = vector.load %arg16[%c0_57, %c0_58] : memref<1x16xf32, #tpu.memory_space<vmem>>, vector<1x16xf32>
    %cst_59 = arith.constant dense<0.000000e+00> : vector<2x64xf32>
    %73 = tpu.matmul %66, %67, %cst_59 {dimension_numbers = #tpu.dot_dimension_numbers<[1], [0], [0], [1], [0, 0, 1, 1], [], []>} : vector<2x16xf32>, vector<16x64xf32>, vector<2x64xf32> -> vector<2x64xf32>
    %74 = vector.broadcast %68 : vector<1x64xf32> to vector<2x64xf32>
    %75 = arith.addf %73, %74 : vector<2x64xf32>
    %cst_60 = arith.constant dense<0.000000e+00> : vector<64xf32>
    %76 = vector.multi_reduction <add>, %75, %cst_60 [0] : vector<2x64xf32> to vector<64xf32>
    %77 = vector.shape_cast %76 : vector<64xf32> to vector<1x64xf32>
    %cst_61 = arith.constant 2.000000e+00 : f32
    %78 = vector.broadcast %cst_61 : f32 to vector<1x64xf32>
    %79 = arith.divf %77, %78 : vector<1x64xf32>
    %80 = vector.broadcast %79 : vector<1x64xf32> to vector<2x64xf32>
    %81 = arith.subf %75, %80 : vector<2x64xf32>
    %82 = arith.mulf %81, %81 : vector<2x64xf32>
    %cst_62 = arith.constant dense<0.000000e+00> : vector<64xf32>
    %83 = vector.multi_reduction <add>, %82, %cst_62 [0] : vector<2x64xf32> to vector<64xf32>
    %84 = vector.shape_cast %83 : vector<64xf32> to vector<1x64xf32>
    %cst_63 = arith.constant 2.000000e+00 : f32
    %85 = vector.broadcast %cst_63 : f32 to vector<1x64xf32>
    %86 = arith.divf %84, %85 : vector<1x64xf32>
    %87 = vector.broadcast %79 : vector<1x64xf32> to vector<2x64xf32>
    %88 = arith.subf %75, %87 : vector<2x64xf32>
    %cst_64 = arith.constant 9.99999974E-6 : f32
    %89 = vector.broadcast %cst_64 : f32 to vector<1x64xf32>
    %90 = arith.addf %86, %89 : vector<1x64xf32>
    %91 = math.rsqrt %90 : vector<1x64xf32>
    %92 = vector.broadcast %91 : vector<1x64xf32> to vector<2x64xf32>
    %93 = arith.mulf %88, %92 : vector<2x64xf32>
    %94 = vector.broadcast %69 : vector<1x64xf32> to vector<2x64xf32>
    %95 = arith.mulf %93, %94 : vector<2x64xf32>
    %96 = vector.broadcast %70 : vector<1x64xf32> to vector<2x64xf32>
    %97 = arith.addf %95, %96 : vector<2x64xf32>
    %cst_65 = arith.constant 0.000000e+00 : f32
    %98 = vector.broadcast %cst_65 : f32 to vector<2x64xf32>
    %99 = arith.maximumf %97, %98 : vector<2x64xf32>
    %cst_66 = arith.constant dense<0.000000e+00> : vector<2x16xf32>
    %100 = tpu.matmul %99, %71, %cst_66 {dimension_numbers = #tpu.dot_dimension_numbers<[1], [0], [0], [1], [0, 0, 1, 1], [], []>} : vector<2x64xf32>, vector<64x16xf32>, vector<2x16xf32> -> vector<2x16xf32>
    %101 = vector.broadcast %72 : vector<1x16xf32> to vector<2x16xf32>
    %102 = arith.addf %100, %101 : vector<2x16xf32>
    %c0_67 = arith.constant 0 : index
    %c0_68 = arith.constant 0 : index
    %103 = vector.load %arg17[%c0_67, %c0_68] : memref<2x16xf32, #tpu.memory_space<vmem>>, vector<2x16xf32>
    tpu.vector_store %arg17[%c0_67, %c0_68], %102 {strides = array<i32>} : memref<2x16xf32, #tpu.memory_space<vmem>>, vector<2x16xf32>,
    return
  }
}

</mosaic_0001>

<bundles_post_ra>
// kernel: online_network_forward.1
= control target key start
LH: loop header
LB: loop body
LE: loop exit
PB: predicated region body
PF: predicated region fallthrough
CT: control target
= control target key end

     0   :  { %s1784_s0 = inlined_call_operand.vmem [shape: f32[2,18,64], index: 0, kind: input, shape index: {}]   ;;  %s1785_s1 = inlined_call_operand.vmem [shape: f32[3,64,128], index: 1, kind: input, shape index: {}]   ;;  %s1786_s2 = inlined_call_operand.vmem [shape: f32[1,128], index: 2, kind: input, shape index: {}]   ;;  %s1787_s3 = inlined_call_operand.vmem [shape: f32[128,32], index: 3, kind: input, shape index: {}]   ;;  %s1788_s4 = inlined_call_operand.vmem [shape: f32[1,32], index: 4, kind: input, shape index: {}]   ;;  %s1789_s5 = inlined_call_operand.vmem [shape: f32[32,64], index: 5, kind: input, shape index: {}]   ;;  %s1790_s6 = inlined_call_operand.vmem [shape: f32[1,64], index: 6, kind: input, shape index: {}]   ;;  %s1791_s7 = inlined_call_operand.vmem [shape: f32[1,64], index: 7, kind: input, shape index: {}]   ;;  %s1792_s8 = inlined_call_operand.vmem [shape: f32[1,64], index: 8, kind: input, shape index: {}]   ;;  %s1793_s9 = inlined_call_operand.vmem [shape: f32[64,16], index: 9, kind: input, shape index: {}]   ;;  %s1794_s10 = inlined_call_operand.vmem [shape: f32[1,16], index: 10, kind: input, shape index: {}]   ;;  %s1795_s11 = inlined_call_operand.vmem [shape: f32[16,64], index: 11, kind: input, shape index: {}]   ;;  %s1796_s12 = inlined_call_operand.vmem [shape: f32[1,64], index: 12, kind: input, shape index: {}]   ;;  %s1797_s13 = inlined_call_operand.vmem [shape: f32[1,64], index: 13, kind: input, shape index: {}]   ;;  %s1798_s14 = inlined_call_operand.vmem [shape: f32[1,64], index: 14, kind: input, shape index: {}]   ;;  %s1799_s15 = inlined_call_operand.vmem [shape: f32[64,16], index: 15, kind: input, shape index: {}]   ;;  %s1800_s16 = inlined_call_operand.vmem [shape: f32[1,16], index: 16, kind: input, shape index: {}]   ;;  %s1801_s17 = inlined_call_operand.hbm [shape: f32[2,16], index: 17, kind: output, shape index: {}]  }
   0x1   :  { %1804 = sst [smem:[#allocation5_spill]] %s1784_s0 }
   0x2   :  { %1805 = sst [smem:[#allocation6_spill]] %s1785_s1 }
   0x3   :  { %s1806_s26 = sld [smem:[#allocation6_spill]]  ;;  %vm82_vm0 = vcmask 523264   ;;  %v1379_v5 = vmov 0.0|0.0   ;;  %s1807_s24 = sld [smem:[#allocation5_spill]]  ;;  %v420_v16 = vld [vmem:[%s1787_s3] sm:$0xff]  ;;  %v421_v17 = vld [vmem:[%s1787_s3 + $0x8] sm:$0xff] }
   0x4   :  { %1282 = vmatprep.subr.bf16.mxu1 %v1379_v5  ;;  %v422_v18 = vld [vmem:[%s1787_s3 + $0x10] sm:$0xff]  ;;  %v1283_v20 = vpack.c.bf16 %v421_v17, %v420_v16  ;;  %v423_v21 = vld [vmem:[%s1787_s3 + $0x18] sm:$0xff] }
   0x9   :  { %v956_v0 = vld [vmem:[%s1806_s26 + $0x40] sm:$0xff]  ;;  %v957_v1 = vld [vmem:[%s1806_s26 + $0x48] sm:$0xff]  ;;  %v958_v2 = vld [vmem:[%s1806_s26 + $0x50] sm:$0xff] }
   0xa   :  { %v1234_v3 = vpack.c.bf16 %v957_v1, %v956_v0  ;;  %v959_v4 = vld [vmem:[%s1806_s26 + $0x58] sm:$0xff]  ;;  %v960_v7 = vld [vmem:[%s1806_s26 + $0x60] sm:$0xff]  ;;  %v961_v8 = vld [vmem:[%s1806_s26 + $0x68] sm:$0xff] }
   0xb   :  { %v1238_v6 = vpack.c.bf16 %v959_v4, %v958_v2  ;;  %v69_v9 = vld [vmem:[%s1807_s24 + $0x1] sm:$0xff]  ;;  %v1242_v10 = vpack.c.bf16 %v961_v8, %v960_v7  ;;  %v962_v11 = vld [vmem:[%s1806_s26 + $0x70] sm:$0xff]  ;;  %v963_v12 = vld [vmem:[%s1806_s26 + $0x78] sm:$0xff] }
   0xc   :  { %1235 = vmatprep.subr.bf16.mxu0 %v1234_v3  ;;  %1093 = vmatprep.mubr.msk.f32.mxu0 %vm82_vm0, %v69_v9  ;;  %v1246_v13 = vpack.c.bf16 %v963_v12, %v962_v11  ;;  %v61_v14 = vld [vmem:[%s1806_s26] sm:$0xff]  ;;  %v62_v15 = vld [vmem:[%s1806_s26 + $0x8] sm:$0xff] }
   0xd   :  { %1237 = vmatpush3.bf16.msra.mxu0 %v1234_v3  ;;  %v1250_v19 = vpack.c.bf16 %v62_v15, %v61_v14 }
   0xe   :  { %1239 = vmatprep.subr.bf16.mxu0 %v1238_v6 }
  0x11   :  { %1241 = vmatpush3.bf16.msra.mxu0 %v1238_v6 }
  0x12   :  { %1243 = vmatprep.subr.bf16.mxu0 %v1242_v10 }
  0x15   :  { %1245 = vmatpush3.bf16.msra.mxu0 %v1242_v10 }
  0x16   :  { %1247 = vmatprep.subr.bf16.mxu0 %v1246_v13 }
  0x17   :  { %22 = vsyncpa [#allocation3], 0  ;;  %v63_v22 = vld [vmem:[%s1806_s26 + $0x10] sm:$0xff]  ;;  %v64_v23 = vld [vmem:[%s1806_s26 + $0x18] sm:$0xff]  ;;  %1284 = vmatpush3.bf16.msra.mxu1 %v1283_v20  ;;  %v1286_v24 = vpack.c.bf16 %v423_v21, %v422_v18  ;;  %vm1380_vm1 = vmmov 0   ;;  %v1381_v10 = vmov 0.0  }
  0x18   :  { %v70_v25 = vld [vmem:[%s1807_s24 + $0x9] sm:$0xff]  ;;  %1285 = vmatprep.subr.bf16.mxu1 %v1379_v5  ;;  %v1254_v26 = vpack.c.bf16 %v64_v23, %v63_v22  ;;  %v71_v27 = vld [vmem:[%s1807_s24 + $0x19] sm:$0xff]  ;;  %v72_v30 = vld [vmem:[%s1807_s24 + $0x21] sm:$0xff]  ;;  %1175 = vmatprep.mubr.msk.f32.mxu1 %vm1380_vm1, %v1381_v10  ;;  %vm445_vm2 = vcmask 1041409   ;;  %vm540_vm3 = vcmask 261120   ;;  %vm614_vm4 = vcmask 517120  }
  0x19   :  { %1249 = vmatpush3.bf16.msra.mxu0 %v1246_v13  ;;  %v65_v28 = vld [vmem:[%s1806_s26 + $0x20] sm:$0xff]  ;;  %v66_v29 = vld [vmem:[%s1806_s26 + $0x28] sm:$0xff]  ;;  %v67_v33 = vld [vmem:[%s1806_s26 + $0x30] sm:$0xff]  ;;  %vm751_vm5 = vcmask 130048   ;;  %vm940_vm6 = vcmask 123904  }
  0x1a   :  { %1251 = vmatprep.subr.bf16.mxu0 %v1250_v19  ;;  %v1258_v31 = vpack.c.bf16 %v66_v29, %v65_v28  ;;  %v57_v32 = vld [vmem:[%s1807_s24] sm:$0xff]  ;;  %v68_v34 = vld [vmem:[%s1806_s26 + $0x38] sm:$0xff]  ;;  %v973_v37 = vld [vmem:[%s1806_s26 + $0x88] sm:$0xff] }
  0x1b   :  { %1287 = vmatpush3.bf16.msra.mxu1 %v1286_v24  ;;  %v1262_v35 = vpack.c.bf16 %v68_v34, %v67_v33  ;;  %v972_v36 = vld [vmem:[%s1806_s26 + $0x80] sm:$0xff]  ;;  %v974_v39 = vld [vmem:[%s1806_s26 + $0x90] sm:$0xff]  ;;  %v975_v40 = vld [vmem:[%s1806_s26 + $0x98] sm:$0xff] }
  0x1c   :  { %1094 = vmatmul.mubr.msk.f32.vlgmr.msra.gmra.mrb[0].mxu0 %vm82_vm0, %v70_v25  ;;  %1288 = vmatprep.subr.bf16.mxu1 %v1379_v5  ;;  %v1266_v38 = vpack.c.bf16 %v973_v37, %v972_v36  ;;  %v58_v41 = vld [vmem:[%s1807_s24 + $0x8] sm:$0xff]  ;;  %v1270_v42 = vpack.c.bf16 %v975_v40, %v974_v39  ;;  %v59_v43 = vld [vmem:[%s1807_s24 + $0x18] sm:$0xff]  ;;  %v976_v44 = vld [vmem:[%s1806_s26 + $0xa0] sm:$0xff] }
  0x1d   :  { %1253 = vmatpush3.bf16.msra.mxu0 %v1250_v19  ;;  %1096 = vmatprep.mubr.msk.f32.mxu0 %vm82_vm0, %v71_v27  ;;  %v977_v45 = vld [vmem:[%s1806_s26 + $0xa8] sm:$0xff]  ;;  %v60_v46 = vld [vmem:[%s1807_s24 + $0x20] sm:$0xff]  ;;  %v978_v49 = vld [vmem:[%s1806_s26 + $0xb0] sm:$0xff] }
  0x1e   :  { %1255 = vmatprep.subr.bf16.mxu0 %v1254_v26  ;;  %v1274_v47 = vpack.c.bf16 %v977_v45, %v976_v44  ;;  %v277_v48 = vld [vmem:[%s1807_s24 + $0x2] sm:$0xff]  ;;  %v979_v50 = vld [vmem:[%s1806_s26 + $0xb8] sm:$0xff]  ;;  %v278_v52 = vld [vmem:[%s1807_s24 + $0xa] sm:$0xff] }
  0x1f   :  { %v1278_v51 = vpack.c.bf16 %v979_v50, %v978_v49  ;;  %v279_v53 = vld [vmem:[%s1807_s24 + $0x1a] sm:$0xff]  ;;  %v280_v54 = vld [vmem:[%s1807_s24 + $0x22] sm:$0xff]  ;;  %v426_v58 = vld [vmem:[%s1787_s3 + $0x30] sm:$0xff] }
  0x20   :  { %1097 = vmatmul.mubr.msk.f32.gmra.mrb[2].mxu0 %vm82_vm0, %v72_v30  ;;  %v424_v55 = vld [vmem:[%s1787_s3 + $0x20] sm:$0xff]  ;;  %v425_v56 = vld [vmem:[%s1787_s3 + $0x28] sm:$0xff]  ;;  %v427_v59 = vld [vmem:[%s1787_s3 + $0x38] sm:$0xff] }
  0x21   :  { %1257 = vmatpush3.bf16.msra.mxu0 %v1254_v26  ;;  %1115 = vmatprep.mubr.msk.f32.mxu0 %vm82_vm0, %v57_v32  ;;  %v1289_v57 = vpack.c.bf16 %v425_v56, %v424_v55  ;;  %v1292_v60 = vpack.c.bf16 %v427_v59, %v426_v58  ;;  %v428_v61 = vld [vmem:[%s1787_s3 + $0x40] sm:$0xff]  ;;  %v429_v62 = vld [vmem:[%s1787_s3 + $0x48] sm:$0xff]  ;;  %v430_v0 = vld [vmem:[%s1787_s3 + $0x50] sm:$0xff] }
  0x22   :  { %1259 = vmatprep.subr.bf16.mxu0 %v1258_v31  ;;  %v1295_v63 = vpack.c.bf16 %v429_v62, %v428_v61  ;;  %v431_v1 = vld [vmem:[%s1787_s3 + $0x58] sm:$0xff]  ;;  %v432_v3 = vld [vmem:[%s1787_s3 + $0x60] sm:$0xff]  ;;  %v433_v4 = vld [vmem:[%s1787_s3 + $0x68] sm:$0xff] }
  0x23   :  { %1290 = vmatpush3.bf16.msra.mxu1 %v1289_v57  ;;  %v1298_v2 = vpack.c.bf16 %v431_v1, %v430_v0  ;;  %v1301_v6 = vpack.c.bf16 %v433_v4, %v432_v3  ;;  %v434_v7 = vld [vmem:[%s1787_s3 + $0x70] sm:$0xff]  ;;  %v435_v8 = vld [vmem:[%s1787_s3 + $0x78] sm:$0xff]  ;;  %v984_v11 = vld [vmem:[%s1786_s2] ss:$0 sm:$0xff] }
  0x24   :  { %1291 = vmatprep.subr.bf16.mxu1 %v1379_v5  ;;  %v1304_v9 = vpack.c.bf16 %v435_v8, %v434_v7  ;;  %v519_v36 = vld [vmem:[%s1789_s5 + $0x8] sm:$0xff]  ;;  %v985_v45 = vld [vmem:[%s1788_s4] ss:$0 sm:$0xff]  ;;  %v531_v58 = vld [vmem:[%s1793_s9 + $0x30] sm:$0xff]  ;;  %s1382_s4 = smov [#allocation2]  }
  0x25   :  { %1261 = vmatpush3.bf16.msra.mxu0 %v1258_v31  ;;  %v525_v49 = vld [vmem:[%s1793_s9] sm:$0xff]  ;;  %v526_v50 = vld [vmem:[%s1793_s9 + $0x8] sm:$0xff]  ;;  %v532_v59 = vld [vmem:[%s1793_s9 + $0x38] sm:$0xff] }
  0x26   :  { %1263 = vmatprep.subr.bf16.mxu0 %v1262_v35  ;;  %v529_v55 = vld [vmem:[%s1793_s9 + $0x20] sm:$0xff]  ;;  %v530_v56 = vld [vmem:[%s1793_s9 + $0x28] sm:$0xff] }
  0x27   :  { %1293 = vmatpush3.bf16.msra.mxu1 %v1292_v60  ;;  %v1319_v57 = vpack.c.bf16 %v530_v56, %v529_v55  ;;  %v1322_v60 = vpack.c.bf16 %v532_v59, %v531_v58  ;;  %v986_v61 = vld [vmem:[%s1790_s6] ss:$0 sm:$0xff] }
  0x28   :  { %1294 = vmatprep.subr.bf16.mxu1 %v1379_v5 }
  0x29   :  { %1265 = vmatpush3.bf16.msra.mxu0 %v1262_v35  ;;  %v518_v35 = vld [vmem:[%s1789_s5] sm:$0xff] }
  0x2a   :  { %1267 = vmatprep.subr.bf16.mxu0 %v1266_v38  ;;  %v1307_v40 = vpack.c.bf16 %v519_v36, %v518_v35  ;;  %v736_v36 = vld [vmem:[%s1799_s15] sm:$0xff] }
  0x2b   :  { %1296 = vmatpush3.bf16.msra.mxu1 %v1295_v63 }
  0x2c   :  { %1116 = vmatmul.mubr.msk.f32.vlgmr.msra.gmra.mrb[0].mxu0 %vm82_vm0, %v58_v41  ;;  %1297 = vmatprep.subr.bf16.mxu1 %v1379_v5 }
  0x2d   :  { %1269 = vmatpush3.bf16.msra.mxu0 %v1266_v38  ;;  %1118 = vmatprep.mubr.msk.f32.mxu0 %vm82_vm0, %v59_v43  ;;  %v521_v43 = vld [vmem:[%s1789_s5 + $0x18] sm:$0xff] }
  0x2e   :  { %1271 = vmatprep.subr.bf16.mxu0 %v1270_v42 }
  0x2f   :  { %1299 = vmatpush3.bf16.msra.mxu1 %v1298_v2 }
  0x30   :  { %1119 = vmatmul.mubr.msk.f32.gmra.mrb[2].mxu0 %vm82_vm0, %v60_v46  ;;  %1300 = vmatprep.subr.bf16.mxu1 %v1379_v5 }
  0x31   :  { %1273 = vmatpush3.bf16.msra.mxu0 %v1270_v42  ;;  %1137 = vmatprep.mubr.msk.f32.mxu0 %vm82_vm0, %v277_v48  ;;  %v520_v42 = vld [vmem:[%s1789_s5 + $0x10] sm:$0xff] }
  0x32   :  { %1275 = vmatprep.subr.bf16.mxu0 %v1274_v47  ;;  %v1310_v44 = vpack.c.bf16 %v521_v43, %v520_v42  ;;  %v741_v42 = vld [vmem:[%s1799_s15 + $0x28] sm:$0xff] }
  0x33   :  { %1302 = vmatpush3.bf16.msra.mxu1 %v1301_v6 }
  0x34   :  { %1303 = vmatprep.subr.bf16.mxu1 %v1379_v5 }
  0x35   :  { %1277 = vmatpush3.bf16.msra.mxu0 %v1274_v47 }
  0x36   :  { %1279 = vmatprep.subr.bf16.mxu0 %v1278_v51 }
  0x37   :  { %1305 = vmatpush3.bf16.msra.mxu1 %v1304_v9 }
  0x38   :  { %1306 = vmatprep.subr.bf16.mxu1 %v1379_v5 }
  0x39   :  { %1281 = vmatpush3.bf16.msra.mxu0 %v1278_v51  ;;  %v1313_v51 = vpack.c.bf16 %v526_v50, %v525_v49 }
  0x3a   :  { %1327 = vmatprep.subr.bf16.mxu0 %v1379_v5 }
  0x3c   :  { %1138 = vmatmul.mubr.msk.f32.vlgmr.msra.gmra.mrb[0].mxu0 %vm82_vm0, %v278_v52  ;;  %v527_v52 = vld [vmem:[%s1793_s9 + $0x10] sm:$0xff] }
  0x3d   :  { %1140 = vmatprep.mubr.msk.f32.mxu0 %vm82_vm0, %v279_v53  ;;  %v528_v53 = vld [vmem:[%s1793_s9 + $0x18] sm:$0xff] }
  0x40   :  { %1141 = vmatmul.mubr.msk.f32.gmra.mrb[2].mxu0 %vm82_vm0, %v280_v54  ;;  %v1316_v54 = vpack.c.bf16 %v528_v53, %v527_v52 }
  0x41   :  { %1231 = vmatprep.mubr.msk.f32.mxu0 %vm1380_vm1, %v1381_v10 }
 0x10f   :  { %v1139_v12 = vpop.f32.mrb[0].mxu0 }
 0x110   :  { %v399_v13 = vadd.f32 %v1139_v12, %v984_v11  ;;  %v368_v14 = vpop.f32.mrb[1].mxu0 }
 0x111   :  { %v398_v15 = vadd.f32 %v984_v11, %v368_v14 }
 0x112   :  { %v403_v16 = vmax.f32 %v399_v13, 0.0 }
 0x113   :  { %v402_v17 = vmax.f32 %v398_v15, 0.0  ;;  %v1142_v18 = vpop.f32.mrb[2].mxu0 }
 0x114   :  { %v401_v19 = vadd.f32 %v1142_v18, %v984_v11  ;;  %v378_v20 = vpop.f32.mrb[3].mxu0 }
 0x115   :  { %v406_v21 = vadd.f32 %v403_v16, %v402_v17  ;;  %v400_v22 = vadd.f32 %v984_v11, %v378_v20 }
 0x116   :  { %v405_v23 = vmax.f32 %v401_v19, 0.0 }
 0x117   :  { %v407_v24 = vrot.slane %v406_v21, 4  ;;  %v404_v25 = vmax.f32 %v400_v22, 0.0 }
 0x119   :  { %v408_v26 = vadd.f32 %v407_v24, %v406_v21  ;;  %v413_v27 = vadd.f32 %v405_v23, %v404_v25  ;;  %v988_v23 = vld [vmem:[%s1791_s7] ss:$0 sm:$0xff]  ;;  %s948_s7 = sshll.u32 %s1382_s4, 4  ;;  %s949_s7 = int_to_ptr.vmem [resolvable:$true] %s948_s7 }
 0x11a   :  { %v989_v25 = vld [vmem:[%s1792_s8] ss:$0 sm:$0xff]  ;;  %p1360_p1 = scmp.lt.s32.totalorder %s949_s7, %s949_s7 }
 0x11b   :  { %v409_v28 = vrot.slane %v408_v26, 2  ;;  %v414_v29 = vrot.slane %v413_v27, 4 }
 0x11d   :  { %v410_v30 = vadd.f32 %v409_v28, %v408_v26  ;;  %v415_v31 = vadd.f32 %v414_v29, %v413_v27  ;;  %v731_v27 = vld [vmem:[%s1795_s11] sm:$0xff]  ;;  %v732_v28 = vld [vmem:[%s1795_s11 + $0x8] sm:$0xff] }
 0x11f   :  { %v416_v32 = vrot.slane %v415_v31, 2  ;;  %v411_v34 = vrot.slane %v410_v30, 1 }
 0x121   :  { %v417_v33 = vadd.f32 %v416_v32, %v415_v31  ;;  %v412_v38 = vadd.f32 %v411_v34, %v410_v30  ;;  %v1325_v30 = vpack.c.bf16 %v732_v28, %v731_v27  ;;  %v990_v32 = vld [vmem:[%s1794_s10] ss:$0 sm:$0xff] }
 0x123   :  { %v418_v37 = vrot.slane %v417_v33, 1 }
 0x125   :  { %v419_v39 = vadd.f32 %v418_v37, %v417_v33  ;;  %v737_v37 = vld [vmem:[%s1799_s15 + $0x8] sm:$0xff] }
 0x127   :  { %v446_v41 = vsel %vm445_vm2, %v419_v39, %v412_v38  ;;  %v1328_v38 = vpack.c.bf16 %v737_v37, %v736_v36  ;;  %v739_v39 = vld [vmem:[%s1799_s15 + $0x18] sm:$0xff] }
 0x128   :  { %1176 = vmatmul.mubr.f32.vlgmr.msra.gmra.mrb[0].mxu1 %v446_v41  ;;  %v740_v41 = vld [vmem:[%s1799_s15 + $0x20] sm:$0xff] }
 0x129   :  { %1308 = vmatpush3.bf16.msra.mxu1 %v1307_v40  ;;  %1186 = vmatprep.mubr.msk.f32.mxu1 %vm1380_vm1, %v1381_v10  ;;  %v1334_v43 = vpack.c.bf16 %v741_v42, %v740_v41 }
 0x12a   :  { %1309 = vmatprep.subr.bf16.mxu1 %v1379_v5  ;;  %1329 = vmatpush3.bf16.msra.mxu0 %v1328_v38 }
 0x12b   :  { %1330 = vmatprep.subr.bf16.mxu0 %v1379_v5 }
 0x12d   :  { %1311 = vmatpush3.bf16.msra.mxu1 %v1310_v44  ;;  %v742_v44 = vld [vmem:[%s1799_s15 + $0x30] sm:$0xff] }
 0x12e   :  { %1312 = vmatprep.subr.bf16.mxu1 %v1379_v5 }
 0x1fb   :  { %v514_v46 = vpop.f32.mrb[0].mxu1 }
 0x1fc   :  { %v515_v47 = vadd.f32 %v985_v45, %v514_v46  ;;  %v1177_v48 = vpop.f32.mrb[1].mxu1  ;;  %v743_v45 = vld [vmem:[%s1799_s15 + $0x38] sm:$0xff] }
 0x1fd   :  { %v1337_v46 = vpack.c.bf16 %v743_v45, %v742_v44 }
 0x1fe   :  { %1187 = vmatmul.mubr.msk.f32.vlgmr.msra.gmra.mrb[2].mxu1 %vm540_vm3, %v515_v47  ;;  %v992_v47 = vld [vmem:[%s1796_s12] ss:$0 sm:$0xff] }
 0x1ff   :  { %1205 = vmatprep.mubr.msk.f32.mxu1 %vm1380_vm1, %v1381_v10  ;;  %1314 = vmatpush3.bf16.msra.mxu1 %v1313_v51 }
 0x200   :  { %1315 = vmatprep.subr.bf16.mxu1 %v1379_v5 }
 0x203   :  { %1317 = vmatpush3.bf16.msra.mxu1 %v1316_v54 }
 0x204   :  { %1318 = vmatprep.subr.bf16.mxu1 %v1379_v5 }
 0x207   :  { %1320 = vmatpush3.bf16.msra.mxu1 %v1319_v57 }
 0x208   :  { %1321 = vmatprep.subr.bf16.mxu1 %v1379_v5 }
 0x20b   :  { %1323 = vmatpush3.bf16.msra.mxu1 %v1322_v60 }
 0x20c   :  { %1324 = vmatprep.subr.bf16.mxu1 %v1379_v5 }
 0x2d1   :  { %v610_v62 = vpop.f32.mrb[2].mxu1 }
 0x2d2   :  { %v611_v63 = vadd.f32 %v986_v61, %v610_v62  ;;  %v1188_v0 = vpop.f32.mrb[3].mxu1 }
 0x2d4   :  { %v615_v1 = vsel %vm614_vm4, %v611_v63, 0.0 }
 0x2d5   :  { %v616_v2 = vrot.slane %v615_v1, 4 }
 0x2d7   :  { %v617_v3 = vadd.f32 %v616_v2, %v615_v1 }
 0x2d9   :  { %v618_v4 = vrot.slane %v617_v3, 2 }
 0x2db   :  { %v619_v6 = vadd.f32 %v618_v4, %v617_v3 }
 0x2dd   :  { %v620_v7 = vrot.slane %v619_v6, 1 }
 0x2df   :  { %v621_v8 = vadd.f32 %v620_v7, %v619_v6  ;;  %v994_v7 = vld [vmem:[%s1797_s13] ss:$0 sm:$0xff]  ;;  %s1355_s13 = scalar_lea.vmem %s949_s7, 32 }
 0x2e0   :  { %p1356_p0 = scmp.ne.s32.totalorder %s949_s7, %s1355_s13  ;;  %p1361_p2 = scmp.lt.s32.totalorder %s1355_s13, %s1355_s13 }
 0x2e1   :  { %v623_v9 = vmul.f32 0.5, %v621_v8 }
 0x2e2   :  { %p1362_p3 = por %p1361_p2, %p1360_p1 }
 0x2e3   :  { %v624_v11 = vsub.f32 %v611_v63, %v623_v9  ;;  %v995_v9 = vld [vmem:[%s1798_s14] ss:$0 sm:$0xff] }
 0x2e4   :  { %p1363_p4 = pnand %p1362_p3, %p1356_p0 }
 0x2e5   :  { %v625_v12 = vmul.f32 %v624_v11, %v624_v11 }
 0x2e7   :  { %v626_v13 = vsel %vm614_vm4, %v625_v12, 0.0 }
 0x2e8   :  { %v627_v14 = vrot.slane %v626_v13, 4 }
 0x2ea   :  { %v628_v15 = vadd.f32 %v627_v14, %v626_v13  ;;  %v996_v14 = vld [vmem:[%s1800_s16] ss:$0 sm:$0xff] }
 0x2ec   :  { %v629_v16 = vrot.slane %v628_v15, 2 }
 0x2ee   :  { %v630_v17 = vadd.f32 %v629_v16, %v628_v15 }
 0x2f0   :  { %v631_v18 = vrot.slane %v630_v17, 1 }
 0x2f2   :  { %v632_v19 = vadd.f32 %v631_v18, %v630_v17 }
 0x2f4   :  { %v633_v20 = vmul.f32 0.5, %v632_v19 }
 0x2f6   :  { %v634_v21 = vadd.f32 1e-05, %v633_v20 }
 0x2f8   :  { %1351 = vrsqrt.f32 %v634_v21 }
 0x302   :  { %v1352_v22 = vpop.eup %1351 }
 0x303   :  { %v636_v24 = vmul.f32 %v1352_v22, %v624_v11 }
 0x305   :  { %v643_v26 = vmul.f32 %v988_v23, %v636_v24 }
 0x307   :  { %v650_v29 = vadd.f32 %v989_v25, %v643_v26 }
 0x309   :  { %v651_v31 = vmax.f32 %v650_v29, 0.0 }
 0x30b   :  { %1206 = vmatmul.mubr.msk.f32.vlgmr.msra.gmra.mrb[4].mxu1 %vm82_vm0, %v651_v31 }
 0x30c   :  { %1326 = vmatpush3.bf16.msra.mxu1 %v1325_v30  ;;  %1212 = vmatprep.mubr.msk.f32.mxu1 %vm1380_vm1, %v1381_v10  ;;  %v738_v10 = vld [vmem:[%s1799_s15 + $0x10] sm:$0xff] }
 0x30d   :  { %v1331_v40 = vpack.c.bf16 %v739_v39, %v738_v10 }
 0x30f   :  { %1332 = vmatpush3.bf16.msra.mxu0 %v1331_v40 }
 0x310   :  { %1333 = vmatprep.subr.bf16.mxu0 %v1379_v5 }
 0x313   :  { %1335 = vmatpush3.bf16.msra.mxu0 %v1334_v43 }
 0x314   :  { %1336 = vmatprep.subr.bf16.mxu0 %v1379_v5 }
 0x317   :  { %1338 = vmatpush3.bf16.msra.mxu0 %v1337_v46 }
 0x3de   :  { %v727_v33 = vpop.f32.mrb[4].mxu1 }
 0x3df   :  { %v728_v34 = vadd.f32 %v990_v32, %v727_v33  ;;  %v1207_v35 = vpop.f32.mrb[5].mxu1 }
 0x3e1   :  { %1213 = vmatmul.mubr.msk.f32.vlgmr.msra.gmra.mrb[6].mxu1 %vm751_vm5, %v728_v34 }
 0x4b4   :  { %v821_v48 = vpop.f32.mrb[6].mxu1 }
 0x4b5   :  { %v822_v49 = vadd.f32 %v992_v47, %v821_v48  ;;  %v1214_v50 = vpop.f32.mrb[7].mxu1 }
 0x4b7   :  { %v825_v51 = vsel %vm614_vm4, %v822_v49, 0.0 }
 0x4b8   :  { %v826_v5 = vrot.slane %v825_v51, 4 }
 0x4ba   :  { %v827_v52 = vadd.f32 %v826_v5, %v825_v51 }
 0x4bc   :  { %v828_v53 = vrot.slane %v827_v52, 2 }
 0x4be   :  { %v829_v54 = vadd.f32 %v828_v53, %v827_v52 }
 0x4c0   :  { %v830_v55 = vrot.slane %v829_v54, 1 }
 0x4c2   :  { %v831_v56 = vadd.f32 %v830_v55, %v829_v54 }
 0x4c4   :  { %v832_v57 = vmul.f32 0.5, %v831_v56 }
 0x4c6   :  { %v833_v58 = vsub.f32 %v822_v49, %v832_v57 }
 0x4c8   :  { %v834_v59 = vmul.f32 %v833_v58, %v833_v58 }
 0x4ca   :  { %v835_v60 = vsel %vm614_vm4, %v834_v59, 0.0 }
 0x4cb   :  { %v836_v61 = vrot.slane %v835_v60, 4 }
 0x4cd   :  { %v837_v62 = vadd.f32 %v836_v61, %v835_v60 }
 0x4cf   :  { %v838_v63 = vrot.slane %v837_v62, 2 }
 0x4d1   :  { %v839_v0 = vadd.f32 %v838_v63, %v837_v62 }
 0x4d3   :  { %v840_v1 = vrot.slane %v839_v0, 1 }
 0x4d5   :  { %v841_v2 = vadd.f32 %v840_v1, %v839_v0 }
 0x4d7   :  { %v842_v3 = vmul.f32 0.5, %v841_v2 }
 0x4d9   :  { %v843_v4 = vadd.f32 1e-05, %v842_v3 }
 0x4db   :  { %1353 = vrsqrt.f32 %v843_v4 }
 0x4e5   :  { %v1354_v6 = vpop.eup %1353 }
 0x4e6   :  { %v845_v8 = vmul.f32 %v1354_v6, %v833_v58 }
 0x4e8   :  { %v852_v11 = vmul.f32 %v994_v7, %v845_v8 }
 0x4ea   :  { %v859_v12 = vadd.f32 %v995_v9, %v852_v11 }
 0x4ec   :  { %v860_v13 = vmax.f32 %v859_v12, 0.0 }
 0x4ee   :  { %1232 = vmatmul.mubr.msk.f32.vlgmr.msra.gmra.mrb[4].mxu0 %vm82_vm0, %v860_v13 }
 0x5c1   :  { %v936_v15 = vpop.f32.mrb[4].mxu0 }
 0x5c2   :  { %v937_v16 = vadd.f32 %v996_v14, %v936_v15  ;;  %v1233_v17 = vpop.f32.mrb[5].mxu0 }
 0x5c4   :  { %941 = vst.msk [vmem:[#allocation2] sm:$0x3] %vm940_vm6, %v937_v16 }
 0x5c5   :  { %1366 = shalt.err (!%p1363_p4)
}
 0x5c6   :  { %s1367_s24 = scalar_lea.hbm %s1801_s17, 32 }
 0x5c7   :  { %p1368_p5 = scmp.ne.s32.totalorder %s1801_s17, %s1367_s24  ;;  %p1371_p6 = scmp.lt.u32.totalorder %s1367_s24, %s1801_s17 }
 0x5c9   :  { %p1373_p7 = pnand %p1371_p6, %p1368_p5 }
 0x5cb   :  { %1376 = shalt.err (!%p1373_p7)
}
 0x5cc   :  { %951 = dma.vmem_to_hbm [thread:$0]  %s949_s7, 32, %s1801_s17, [#allocation3]  }
 0x5cd   :  { %1377 = dma.done.wait [#allocation3], 32  }
 0x5ce   :  { %1378 = vsyncadd [#allocation3], 4294967264 }
 0x5cf   :  { %955 = vsyncpa [#allocation3], 1 }

</bundles_post_ra>
